<compile_context>
chip_gen: v6e
topology: v6e:2x2x1
jax: 0.10.0
libtpu: 0.0.40
codegen_flags: <defaults>
</compile_context>

<pallas_src>
import functools

import jax
import jax.numpy as jnp
from jax.experimental import pallas as pl
from jax.experimental.pallas import tpu as pltpu


def _round_up(x, m):
    return (x + m - 1) // m * m


def _vmem_capacity_bytes():
    try:
        return int(pltpu.get_tpu_info().vmem_capacity_bytes)
    except Exception:
        return 64 << 20  # conservative: v7x per-TensorCore VMEM


# ---------------------------------------------------------------------------
# Path A: tables resident in (single-buffered) VMEM scratch, one-hot MXU gather.
# ---------------------------------------------------------------------------
def _kge_onehot_kernel(hidx_ref, ridx_ref, tidx_ref,   # VMEM (tb, 1) int32 index blocks
                       ent_hbm, rel_hbm,               # raw HBM refs (pl.ANY)
                       h_out, r_out, t_out,            # VMEM (tb, D) output tiles
                       ent_vmem, rel_vmem):            # persistent VMEM table scratch
    # One-time bulk table load; scratch persists across all grid steps.
    # (Batch axis is "arbitrary", so step 0 always runs first on this core.)
    @pl.when(pl.program_id(0) == 0)
    def _():
        pltpu.sync_copy(ent_hbm, ent_vmem)
        pltpu.sync_copy(rel_hbm, rel_vmem)

    tb = h_out.shape[0]
    num_entities = ent_vmem.shape[0]
    num_relations = rel_vmem.shape[0]

    e_iota = jax.lax.broadcasted_iota(jnp.int32, (tb, num_entities), 1)
    r_iota = jax.lax.broadcasted_iota(jnp.int32, (tb, num_relations), 1)

    h_onehot = (hidx_ref[...] == e_iota).astype(ent_vmem.dtype)
    t_onehot = (tidx_ref[...] == e_iota).astype(ent_vmem.dtype)
    r_onehot = (ridx_ref[...] == r_iota).astype(rel_vmem.dtype)

    def _gather(onehot, table):
        kwargs = dict(preferred_element_type=jnp.float32)
        if table.dtype == jnp.float32:
            # Full-precision f32 passes keep the one-hot gather bit-exact.
            kwargs["precision"] = jax.lax.Precision.HIGHEST
        return jnp.dot(onehot, table, **kwargs)

    ent = ent_vmem[...]
    h_out[...] = _gather(h_onehot, ent).astype(h_out.dtype)
    t_out[...] = _gather(t_onehot, ent).astype(t_out.dtype)
    r_out[...] = _gather(r_onehot, rel_vmem[...]).astype(r_out.dtype)


# ---------------------------------------------------------------------------
# Path B: manual multi-in-flight row DMA gather from HBM (large tables).
# ---------------------------------------------------------------------------
def _kge_dma_gather_kernel(head_idx_ref, rel_idx_ref, tail_idx_ref,  # SMEM (scalar prefetch)
                           ent_hbm, rel_hbm,                         # raw HBM refs (pl.ANY)
                           h_out, r_out, t_out,                      # VMEM (tb, D) output tiles
                           sems):                                    # DMA semaphores (3,)
    tb = h_out.shape[0]
    base = pl.program_id(0) * tb

    # Issue all 3*tb row DMAs directly into the pipelined output tiles before
    # the first wait so their latencies overlap (no intermediate scratch).
    for j in range(tb):
        h_idx = head_idx_ref[base + j]
        r_idx = rel_idx_ref[base + j]
        t_idx = tail_idx_ref[base + j]
        pltpu.make_async_copy(ent_hbm.at[pl.ds(h_idx, 1)],
                              h_out.at[pl.ds(j, 1)], sems.at[0]).start()
        pltpu.make_async_copy(rel_hbm.at[pl.ds(r_idx, 1)],
                              r_out.at[pl.ds(j, 1)], sems.at[1]).start()
        pltpu.make_async_copy(ent_hbm.at[pl.ds(t_idx, 1)],
                              t_out.at[pl.ds(j, 1)], sems.at[2]).start()

    # DMA semaphores count transferred bytes: one aggregate (tb, D)-sized wait
    # per stream matches the tb row copies issued on that semaphore (replaces
    # 3*tb blocking waits; descriptor is never started, only sized).
    pltpu.make_async_copy(h_out, h_out, sems.at[0]).wait()
    pltpu.make_async_copy(r_out, r_out, sems.at[1]).wait()
    pltpu.make_async_copy(t_out, t_out, sems.at[2]).wait()


def knowledge_graph_embedding_forward(entity_table, relation_table,
                                      head, relation, tail,
                                      *, block_rows=None,
                                      force_dma_gather=False,
                                      onehot_rows_limit=4096,
                                      resident_table_limit_bytes=None):
    """Equivalent of KnowledgeGraphEmbedding.forward.

    entity_table:   [num_entities,  D]
    relation_table: [num_relations, D]
    head/relation/tail: [B] integer indices (assumed in range, like nn.Embedding)
    returns: (head_emb [B,D], relation_emb [B,D], tail_emb [B,D])
    """
    entity_table = jnp.asarray(entity_table)
    relation_table = jnp.asarray(relation_table)
    ent_dtype = entity_table.dtype
    rel_dtype = relation_table.dtype
    num_entities, D = entity_table.shape
    num_relations, D_r = relation_table.shape
    if D_r != D:
        raise ValueError("entity and relation embedding dims must match")
    B = jnp.asarray(head).shape[0]
    ent_item = jnp.dtype(ent_dtype).itemsize
    rel_item = jnp.dtype(rel_dtype).itemsize

    # Generation-aware VMEM budgeting (v7x: 64 MiB/TC, v5e/v6e: 128 MiB).
    vmem_cap = _vmem_capacity_bytes()
    vmem_budget = (vmem_cap * 3) // 4
    if resident_table_limit_bytes is None:
        resident_table_limit_bytes = vmem_cap // 2

    table_bytes = num_entities * D * ent_item + num_relations * D * rel_item

    # Full sublane group: 8 rows for 4-byte, 16 for 2-byte, 32 for 1-byte.
    sub = max(8, 32 // ent_item)

    use_onehot = ((not force_dma_gather)
                  and table_bytes <= resident_table_limit_bytes
                  and max(num_entities, num_relations) <= onehot_rows_limit)

    if block_rows is not None:
        tb = _round_up(block_rows, sub)
    else:
        tb = _round_up(min(256 if use_onehot else 128, _round_up(B, sub)), sub)

    def _onehot_vmem_bytes(tb_):
        onehot = (2 * num_entities + num_relations) * tb_ * max(ent_item, 4)
        acc = 3 * tb_ * D * 4
        out_buf = 2 * tb_ * D * (2 * ent_item + rel_item)
        idx_buf = 3 * 2 * tb_ * 4
        return table_bytes + onehot + acc + out_buf + idx_buf + (2 << 20)

    if use_onehot:
        while _onehot_vmem_bytes(tb) > vmem_budget and tb > sub:
            tb = max(sub, _round_up(tb // 2, sub))
        if _onehot_vmem_bytes(tb) > vmem_budget:
            use_onehot = False
            if block_rows is None:
                tb = _round_up(min(128, _round_up(B, sub)), sub)

    b_pad = _round_up(B, tb)
    grid = (b_pad // tb,)

    def _pad_idx(idx):
        idx = jnp.asarray(idx, dtype=jnp.int32).reshape(-1)
        if b_pad != B:
            idx = jnp.concatenate([idx, jnp.zeros((b_pad - B,), jnp.int32)])
        return idx

    head_i, rel_i, tail_i = _pad_idx(head), _pad_idx(relation), _pad_idx(tail)

    out_shapes = (jax.ShapeDtypeStruct((b_pad, D), ent_dtype),
                  jax.ShapeDtypeStruct((b_pad, D), rel_dtype),
                  jax.ShapeDtypeStruct((b_pad, D), ent_dtype))

    if use_onehot:
        kernel = _kge_onehot_kernel
        out_specs = [pl.BlockSpec((tb, D), lambda i: (i, 0)) for _ in range(3)]
        in_specs = [
            pl.BlockSpec((tb, 1), lambda i: (i, 0)),   # head indices
            pl.BlockSpec((tb, 1), lambda i: (i, 0)),   # relation indices
            pl.BlockSpec((tb, 1), lambda i: (i, 0)),   # tail indices
            pl.BlockSpec(memory_space=pl.ANY),         # entity table (HBM, passed once)
            pl.BlockSpec(memory_space=pl.ANY),         # relation table (HBM)
        ]
        scratch_shapes = [pltpu.VMEM((num_entities, D), ent_dtype),
                          pltpu.VMEM((num_relations, D), rel_dtype)]
        grid_spec = pltpu.PrefetchScalarGridSpec(
            num_scalar_prefetch=0, grid=grid, in_specs=in_specs,
            out_specs=out_specs, scratch_shapes=scratch_shapes)
        args = (head_i.reshape(b_pad, 1), rel_i.reshape(b_pad, 1),
                tail_i.reshape(b_pad, 1), entity_table, relation_table)
        vmem_needed = _onehot_vmem_bytes(tb)
        flops = 2 * b_pad * D * (2 * num_entities + num_relations)
        bytes_accessed = (table_bytes + 3 * b_pad * 4
                          + b_pad * D * (2 * ent_item + rel_item))
        # "arbitrary": the one-time table load is gated on program_id == 0, so
        # the batch axis must run sequentially from step 0 on a single core
        # (a megacore "parallel" split could hand a core a chunk without step 0).
        dim_sem = ("arbitrary",)
    else:
        kernel = _kge_dma_gather_kernel
        out_specs = [pl.BlockSpec((tb, D), lambda i, h, r, t: (i, 0))
                     for _ in range(3)]
        in_specs = [
            pl.BlockSpec(memory_space=pl.ANY),   # entity table stays in HBM
            pl.BlockSpec(memory_space=pl.ANY),   # relation table stays in HBM
        ]
        scratch_shapes = [pltpu.SemaphoreType.DMA((3,))]
        grid_spec = pltpu.PrefetchScalarGridSpec(
            num_scalar_prefetch=3, grid=grid, in_specs=in_specs,
            out_specs=out_specs, scratch_shapes=scratch_shapes)
        args = (head_i, rel_i, tail_i, entity_table, relation_table)
        vmem_needed = 2 * tb * D * (2 * ent_item + rel_item) + (1 << 20)
        flops = 0
        bytes_accessed = 3 * b_pad * 4 + 2 * b_pad * D * (2 * ent_item + rel_item)
        dim_sem = ("parallel",)
        # TODO(synk): cross-grid-step prefetch (2, tb, D) double-buffer would
        # additionally hide the first-wave row-DMA latency of each step.

    compiler_kwargs = dict(dimension_semantics=dim_sem)
    if vmem_needed > (16 << 20):
        compiler_kwargs["vmem_limit_bytes"] = int(
            min(max(vmem_needed, 16 << 20), vmem_budget))

    fn = pl.pallas_call(
        kernel,
        out_shape=out_shapes,
        grid_spec=grid_spec,
        compiler_params=pltpu.CompilerParams(**compiler_kwargs),
        cost_estimate=pl.CostEstimate(flops=int(flops), transcendentals=0,
                                      bytes_accessed=int(bytes_accessed)),
    )
    h_emb, r_emb, t_emb = fn(*args)
    return h_emb[:B], r_emb[:B], t_emb[:B]


if __name__ == "__main__":
    # Small, deterministic problem sizes consistent with the module.
    num_entities = 32
    num_relations = 8
    embedding_dim = 128
    batch = 8

    key = jax.random.PRNGKey(0)
    k_ent, k_rel, k_h, k_r, k_t = jax.random.split(key, 5)

    # nn.Embedding default init is N(0, 1).
    entity_table = jax.random.normal(k_ent, (num_entities, embedding_dim),
                                     dtype=jnp.float32)
    relation_table = jax.random.normal(k_rel, (num_relations, embedding_dim),
                                       dtype=jnp.float32)

    head = jax.random.randint(k_h, (batch,), 0, num_entities, dtype=jnp.int32)
    relation = jax.random.randint(k_r, (batch,), 0, num_relations, dtype=jnp.int32)
    tail = jax.random.randint(k_t, (batch,), 0, num_entities, dtype=jnp.int32)

    # Reference (plain JAX embedding lookup).
    ref_h = jnp.take(entity_table, head, axis=0)
    ref_r = jnp.take(relation_table, relation, axis=0)
    ref_t = jnp.take(entity_table, tail, axis=0)

    def _check(name, got, want, exact):
        if exact:
            ok = bool(jnp.array_equal(got, want))
        else:
            ok = bool(jnp.allclose(got, want, atol=1e-6, rtol=1e-6))
        assert ok, f"{name} mismatch"

    # Path A: VMEM-resident tables + one-hot MXU gather (auto-selected here).
    h_emb, r_emb, t_emb = knowledge_graph_embedding_forward(
        entity_table, relation_table, head, relation, tail)
    jax.block_until_ready((h_emb, r_emb, t_emb))
    _check("head(A)", h_emb, ref_h, exact=False)
    _check("rel(A)", r_emb, ref_r, exact=False)
    _check("tail(A)", t_emb, ref_t, exact=False)

    # Path A with a multi-step grid (exercises the persistent table scratch).
    big_batch = 24
    kh2, kr2, kt2 = jax.random.split(jax.random.PRNGKey(1), 3)
    head2 = jax.random.randint(kh2, (big_batch,), 0, num_entities, jnp.int32)
    rel2 = jax.random.randint(kr2, (big_batch,), 0, num_relations, jnp.int32)
    tail2 = jax.random.randint(kt2, (big_batch,), 0, num_entities, jnp.int32)
    h3, r3, t3 = knowledge_graph_embedding_forward(
        entity_table, relation_table, head2, rel2, tail2, block_rows=8)
    jax.block_until_ready((h3, r3, t3))
    _check("head(A,multi)", h3, jnp.take(entity_table, head2, axis=0), exact=False)
    _check("rel(A,multi)", r3, jnp.take(relation_table, rel2, axis=0), exact=False)
    _check("tail(A,multi)", t3, jnp.take(entity_table, tail2, axis=0), exact=False)

    # Path B: manual multi-in-flight row DMA gather (large-table fallback).
    h2, r2, t2 = knowledge_graph_embedding_forward(
        entity_table, relation_table, head, relation, tail,
        force_dma_gather=True)
    jax.block_until_ready((h2, r2, t2))
    _check("head(B)", h2, ref_h, exact=True)
    _check("rel(B)", r2, ref_r, exact=True)
    _check("tail(B)", t2, ref_t, exact=True)

    print("KERNEL_OK")
</pallas_src>

<mosaic_0001>
module attributes {stable_mosaic.version = 11 : i64} {
  func.func @_kge_onehot_kernel(%arg0: i32, %arg1: memref<8x1xi32, #tpu.memory_space<vmem>>, %arg2: memref<8x1xi32, #tpu.memory_space<vmem>>, %arg3: memref<8x1xi32, #tpu.memory_space<vmem>>, %arg4: memref<32x128xf32, #tpu.memory_space<any>>, %arg5: memref<8x128xf32, #tpu.memory_space<any>>, %arg6: memref<8x128xf32, #tpu.memory_space<vmem>>, %arg7: memref<8x128xf32, #tpu.memory_space<vmem>>, %arg8: memref<8x128xf32, #tpu.memory_space<vmem>>, %arg9: memref<32x128xf32, #tpu.memory_space<vmem>>, %arg10: memref<8x128xf32, #tpu.memory_space<vmem>>) attributes {dimension_semantics = [#tpu.dimension_semantics<arbitrary>], iteration_bounds = array<i64: 1>, scalar_prefetch = 0 : i64, scratch_operands = 2 : i64, tpu.core_type = #tpu.core_type<tc>, window_params = [{transform_indices = @transform_0, window_bounds = array<i64: 8, 1>}, {transform_indices = @transform_1, window_bounds = array<i64: 8, 1>}, {transform_indices = @transform_2, window_bounds = array<i64: 8, 1>}, {}, {}, {transform_indices = @transform_5, window_bounds = array<i64: 8, 128>}, {transform_indices = @transform_6, window_bounds = array<i64: 8, 128>}, {transform_indices = @transform_7, window_bounds = array<i64: 8, 128>}]} {
    %c0_i32 = arith.constant 0 : i32
    %0 = arith.cmpi eq, %arg0, %c0_i32 : i32
    %1 = arith.extui %0 : i1 to i32
    %c0_i32_0 = arith.constant 0 : i32
    %2 = arith.cmpi ne, %1, %c0_i32_0 : i32
    scf.if %2 {
      "tpu.region"() ({
        %28 = tpu.sem_alloc : memref<!tpu.dma_semaphore, #tpu.memory_space<semaphore_mem>>
        tpu.enqueue_dma source(%arg4 : memref<32x128xf32, #tpu.memory_space<any>>) target(%arg9 : memref<32x128xf32, #tpu.memory_space<vmem>>) target_semaphore(%28 : memref<!tpu.dma_semaphore, #tpu.memory_space<semaphore_mem>>)
        tpu.wait_dma2 semaphore(%28 : memref<!tpu.dma_semaphore, #tpu.memory_space<semaphore_mem>>) src(%arg4 : memref<32x128xf32, #tpu.memory_space<any>>) dst(%arg9 : memref<32x128xf32, #tpu.memory_space<vmem>>)
        tpu.yield
      }) : () -> ()
      "tpu.region"() ({
        %28 = tpu.sem_alloc : memref<!tpu.dma_semaphore, #tpu.memory_space<semaphore_mem>>
        tpu.enqueue_dma source(%arg5 : memref<8x128xf32, #tpu.memory_space<any>>) target(%arg10 : memref<8x128xf32, #tpu.memory_space<vmem>>) target_semaphore(%28 : memref<!tpu.dma_semaphore, #tpu.memory_space<semaphore_mem>>)
        tpu.wait_dma2 semaphore(%28 : memref<!tpu.dma_semaphore, #tpu.memory_space<semaphore_mem>>) src(%arg5 : memref<8x128xf32, #tpu.memory_space<any>>) dst(%arg10 : memref<8x128xf32, #tpu.memory_space<vmem>>)
        tpu.yield
      }) : () -> ()
    } else {
    }
    %3 = tpu.iota {dimensions = array<i32: 1>} : vector<8x32xi32>
    %4 = tpu.iota {dimensions = array<i32: 1>} : vector<8x8xi32>
    %c0 = arith.constant 0 : index
    %c0_1 = arith.constant 0 : index
    %5 = vector.load %arg1[%c0, %c0_1] : memref<8x1xi32, #tpu.memory_space<vmem>>, vector<8x1xi32>
    %6 = vector.broadcast %5 : vector<8x1xi32> to vector<8x32xi32>
    %7 = arith.cmpi eq, %6, %3 : vector<8x32xi32>
    %8 = arith.extui %7 : vector<8x32xi1> to vector<8x32xi32>
    %9 = arith.sitofp %8 : vector<8x32xi32> to vector<8x32xf32>
    %c0_2 = arith.constant 0 : index
    %c0_3 = arith.constant 0 : index
    %10 = vector.load %arg3[%c0_2, %c0_3] : memref<8x1xi32, #tpu.memory_space<vmem>>, vector<8x1xi32>
    %11 = vector.broadcast %10 : vector<8x1xi32> to vector<8x32xi32>
    %12 = arith.cmpi eq, %11, %3 : vector<8x32xi32>
    %13 = arith.extui %12 : vector<8x32xi1> to vector<8x32xi32>
    %14 = arith.sitofp %13 : vector<8x32xi32> to vector<8x32xf32>
    %c0_4 = arith.constant 0 : index
    %c0_5 = arith.constant 0 : index
    %15 = vector.load %arg2[%c0_4, %c0_5] : memref<8x1xi32, #tpu.memory_space<vmem>>, vector<8x1xi32>
    %16 = vector.broadcast %15 : vector<8x1xi32> to vector<8x8xi32>
    %17 = arith.cmpi eq, %16, %4 : vector<8x8xi32>
    %18 = arith.extui %17 : vector<8x8xi1> to vector<8x8xi32>
    %19 = arith.sitofp %18 : vector<8x8xi32> to vector<8x8xf32>
    %c0_6 = arith.constant 0 : index
    %c0_7 = arith.constant 0 : index
    %20 = vector.load %arg9[%c0_6, %c0_7] : memref<32x128xf32, #tpu.memory_space<vmem>>, vector<32x128xf32>
    %cst = arith.constant dense<0.000000e+00> : vector<8x128xf32>
    %21 = tpu.matmul %9, %20, %cst {dimension_numbers = #tpu.dot_dimension_numbers<[1], [0], [0], [1], [0, 0, 1, 1], [], []>, precision = #tpu.contract_precision<fp32>} : vector<8x32xf32>, vector<32x128xf32>, vector<8x128xf32> -> vector<8x128xf32>
    %c0_8 = arith.constant 0 : index
    %c0_9 = arith.constant 0 : index
    %22 = vector.load %arg6[%c0_8, %c0_9] : memref<8x128xf32, #tpu.memory_space<vmem>>, vector<8x128xf32>
    tpu.vector_store %arg6[%c0_8, %c0_9], %21 {strides = array<i32>} : memref<8x128xf32, #tpu.memory_space<vmem>>, vector<8x128xf32>,
    %cst_10 = arith.constant dense<0.000000e+00> : vector<8x128xf32>
    %23 = tpu.matmul %14, %20, %cst_10 {dimension_numbers = #tpu.dot_dimension_numbers<[1], [0], [0], [1], [0, 0, 1, 1], [], []>, precision = #tpu.contract_precision<fp32>} : vector<8x32xf32>, vector<32x128xf32>, vector<8x128xf32> -> vector<8x128xf32>
    %c0_11 = arith.constant 0 : index
    %c0_12 = arith.constant 0 : index
    %24 = vector.load %arg8[%c0_11, %c0_12] : memref<8x128xf32, #tpu.memory_space<vmem>>, vector<8x128xf32>
    tpu.vector_store %arg8[%c0_11, %c0_12], %23 {strides = array<i32>} : memref<8x128xf32, #tpu.memory_space<vmem>>, vector<8x128xf32>,
    %c0_13 = arith.constant 0 : index
    %c0_14 = arith.constant 0 : index
    %25 = vector.load %arg10[%c0_13, %c0_14] : memref<8x128xf32, #tpu.memory_space<vmem>>, vector<8x128xf32>
    %cst_15 = arith.constant dense<0.000000e+00> : vector<8x128xf32>
    %26 = tpu.matmul %19, %25, %cst_15 {dimension_numbers = #tpu.dot_dimension_numbers<[1], [0], [0], [1], [0, 0, 1, 1], [], []>, precision = #tpu.contract_precision<fp32>} : vector<8x8xf32>, vector<8x128xf32>, vector<8x128xf32> -> vector<8x128xf32>
    %c0_16 = arith.constant 0 : index
    %c0_17 = arith.constant 0 : index
    %27 = vector.load %arg7[%c0_16, %c0_17] : memref<8x128xf32, #tpu.memory_space<vmem>>, vector<8x128xf32>
    tpu.vector_store %arg7[%c0_16, %c0_17], %26 {strides = array<i32>} : memref<8x128xf32, #tpu.memory_space<vmem>>, vector<8x128xf32>,
    return
  }
  func.func @transform_0(%arg0: i32) -> (i32, i32) {
    %c0_i32 = arith.constant 0 : i32
    %c0_i32_0 = arith.constant 0 : i32
    return %arg0, %c0_i32 : i32, i32
  }
  func.func @transform_1(%arg0: i32) -> (i32, i32) {
    %c0_i32 = arith.constant 0 : i32
    %c0_i32_0 = arith.constant 0 : i32
    return %arg0, %c0_i32 : i32, i32
  }
  func.func @transform_2(%arg0: i32) -> (i32, i32) {
    %c0_i32 = arith.constant 0 : i32
    %c0_i32_0 = arith.constant 0 : i32
    return %arg0, %c0_i32 : i32, i32
  }
  func.func @transform_5(%arg0: i32) -> (i32, i32) {
    %c0_i32 = arith.constant 0 : i32
    %c0_i32_0 = arith.constant 0 : i32
    return %arg0, %c0_i32 : i32, i32
  }
  func.func @transform_6(%arg0: i32) -> (i32, i32) {
    %c0_i32 = arith.constant 0 : i32
    %c0_i32_0 = arith.constant 0 : i32
    return %arg0, %c0_i32 : i32, i32
  }
  func.func @transform_7(%arg0: i32) -> (i32, i32) {
    %c0_i32 = arith.constant 0 : i32
    %c0_i32_0 = arith.constant 0 : i32
    return %arg0, %c0_i32 : i32, i32
  }
}

</mosaic_0001>

<bundles_post_ra>
// kernel: tpu_custom_call.1
= control target key start
LH: loop header
LB: loop body
LE: loop exit
PB: predicated region body
PF: predicated region fallthrough
CT: control target
= control target key end

     0   :  { %13 = vsyncpa [#allocation5], 0  ;;  %s2249_s0 = inlined_call_operand.vmem [shape: s32[8,1], index: 0, kind: input, shape index: {}]   ;;  %s2250_s1 = inlined_call_operand.vmem [shape: s32[8,1], index: 1, kind: input, shape index: {}]   ;;  %s2251_s2 = inlined_call_operand.vmem [shape: s32[8,1], index: 2, kind: input, shape index: {}]   ;;  %s2252_s3 = inlined_call_operand.vmem [shape: f32[32,128], index: 3, kind: input, shape index: {}]   ;;  %s2253_s4 = inlined_call_operand.hbm [shape: f32[8,128], index: 4, kind: input, shape index: {}]   ;;  %s2254_s5 = inlined_call_operand.hbm [shape: f32[8,128], index: 5, kind: output, shape index: {0}]   ;;  %s2255_s6 = inlined_call_operand.hbm [shape: f32[8,128], index: 6, kind: output, shape index: {1}]   ;;  %s2256_s7 = inlined_call_operand.hbm [shape: f32[8,128], index: 7, kind: output, shape index: {2}]  }
   0x1   :  { %14 = vsyncpa [#allocation7], 0 }
   0x2   :  { %v58_v0 = vld [vmem:[%s2252_s3] sm:$0xff]  ;;  %v60_v1 = vld [vmem:[%s2252_s3 + $0x8] sm:$0xff]  ;;  %v62_v2 = vld [vmem:[%s2252_s3 + $0x10] sm:$0xff] }
   0x3   :  { %v64_v3 = vld [vmem:[%s2252_s3 + $0x18] sm:$0xff] }
   0x4   :  { %73 = vsyncadd [#allocation9], 512 }
   0x5   :  { %1933 = dma.done.wait [#allocation9], 512 }
   0x6   :  { %1934 = vsyncadd [#allocation9], 4294966784 }
   0x7   :  { %s1941_s9 = smov [#allocation3]  }
   0x8   :  { %s84_s10 = sshll.u32 %s1941_s9, 4  ;;  %s85_s10 = int_to_ptr.vmem [resolvable:$true] %s84_s10 }
   0x9   :  { %s1861_s11 = scalar_lea.vmem %s85_s10, 128  ;;  %p1866_p1 = scmp.lt.s32.totalorder %s85_s10, %s85_s10 }
   0xa   :  { %p1862_p0 = scmp.ne.s32.totalorder %s85_s10, %s1861_s11  ;;  %p1867_p2 = scmp.lt.s32.totalorder %s1861_s11, %s1861_s11 }
   0xc   :  { %p1868_p3 = por %p1867_p2, %p1866_p1 }
   0xe   :  { %p1869_p4 = pnand %p1868_p3, %p1862_p0 }
  0x10   :  { %1872 = shalt.err (!%p1869_p4)  }
  0x11   :  { %87 = dma.hbm_to_vmem [thread:$0]  %s2253_s4, 128, %s85_s10, [#allocation11] }
  0x12   :  { %1935 = dma.done.wait [#allocation11], 128 }
  0x13   :  { %1936 = vsyncadd [#allocation11], 4294967168  ;;  %v93_v4 = vld [vmem:[%s2249_s0] sm:$0xff]  ;;  %v2009_v6 = vand.u32 4294901760, %v64_v3  ;;  %v1942_v7 = vmov 0   ;;  %v2011_v8 = vand.u32 4294901760, %v62_v2  ;;  %v91_v29 = vlaneseq }
  0x14   :  { %v107_v5 = vld [vmem:[%s2250_s1] sm:$0xff]  ;;  %1851 = vset.pattern.permute.xlu0 %v1942_v7  ;;  %1852 = vset.pattern.permute.xlu1 %v1942_v7  ;;  %v2013_v9 = vand.u32 4294901760, %v60_v1  ;;  %v2015_v10 = vand.u32 4294901760, %v58_v0  ;;  %v1943_v13 = vmov 0.0   ;;  %vm1944_vm0 = vmmov 0   ;;  %s1945_s1 = smov [#allocation4]  }
  0x15   :  { %95 = vperm.xlu0 %1851, %v93_v4   ;;  %109 = vperm.xlu1 %1852, %v107_v5   ;;  %v2018_v11 = vsub.f32 %v64_v3, %v2009_v6  ;;  %v100_v12 = vld [vmem:[%s2251_s2] sm:$0xff]  ;;  %v2025_v14 = vsub.f32 %v62_v2, %v2011_v8  ;;  %v2082_v30 = vand.u32 127, %v91_v29  ;;  %vm118_vm1 = vcmask 261120   ;;  %s1555_s2 = sshll.u32 %s1945_s1, 4  ;;  %s1556_s2 = int_to_ptr.vmem [resolvable:$true] %s1555_s2 }
  0x16   :  { %1693 = vmatprep.subr.mxu1 %v1943_v13  ;;  %v2028_v15 = vsub.f32 %v60_v1, %v2013_v9  ;;  %v2031_v16 = vsub.f32 %v58_v0, %v2015_v10  ;;  %1701 = vmatprep.mubr.msk.f32.mxu1 %vm1944_vm0, %v1943_v13  ;;  %v1097_v42 = vld [vmem:[#allocation3] sm:$0xff]  ;;  %vm1098_vm5 = vcmask 64512   ;;  %s1873_s17 = scalar_lea.vmem %s1556_s2, 128  ;;  %p1878_p6 = scmp.lt.s32.totalorder %s1556_s2, %s1556_s2 }
  0x17   :  { %v2036_v17 = vand.u32 4294901760, %v2018_v11  ;;  %1682 = vmatprep.subr.mxu0 %v1943_v13  ;;  %1690 = vmatprep.mubr.msk.f32.mxu0 %vm1944_vm0, %v1943_v13  ;;  %v2042_v18 = vand.u32 4294901760, %v2025_v14  ;;  %v2154_v44 = vand.u32 4294901760, %v1097_v42  ;;  %p1874_p5 = scmp.ne.s32.totalorder %s1556_s2, %s1873_s17  ;;  %p1879_p7 = scmp.lt.s32.totalorder %s1873_s17, %s1873_s17 }
  0x18   :  { %v2045_v19 = vand.u32 4294901760, %v2028_v15  ;;  %v2048_v20 = vand.u32 4294901760, %v2031_v16  ;;  %1683 = vmatpush3.msra.mxu0 %v2009_v6 }
  0x19   :  { %102 = vperm.xlu0 %1851, %v100_v12   ;;  %v229_v21 = vsub.f32 %v2018_v11, %v2036_v17  ;;  %1684 = vmatprep.subr.mxu0 %v1943_v13  ;;  %v236_v22 = vsub.f32 %v2025_v14, %v2042_v18  ;;  %v2166_v46 = vsub.f32 %v1097_v42, %v2154_v44  ;;  %p1880_p8 = por %p1879_p7, %p1878_p6 }
  0x1a   :  { %v243_v23 = vsub.f32 %v2028_v15, %v2045_v19  ;;  %1685 = vmatpush3.msra.mxu0 %v2011_v8  ;;  %v250_v25 = vsub.f32 %v2031_v16, %v2048_v20 }
  0x1b   :  { %v2059_v24 = vand.u32 4294901760, %v229_v21  ;;  %1686 = vmatprep.subr.mxu0 %v1943_v13  ;;  %v2064_v26 = vand.u32 4294901760, %v236_v22  ;;  %v1211_v49 = vand.u32 4294901760, %v2166_v46  ;;  %p1881_p9 = pnand %p1880_p8, %p1874_p5 }
  0x1c   :  { %1687 = vmatpush3.msra.mxu0 %v2013_v9  ;;  %v2068_v27 = vand.u32 4294901760, %v243_v23  ;;  %v2074_v28 = vand.u32 4294901760, %v250_v25 }
  0x1d   :  { %1694 = vmatpush3.msra.mxu1 %v2059_v24  ;;  %1688 = vmatprep.subr.mxu0 %v1943_v13  ;;  %v1212_v51 = vsub.f32 %v2166_v46, %v1211_v49 }
  0x1e   :  { %1695 = vmatprep.subr.mxu1 %v1943_v13  ;;  %1689 = vmatpush3.msra.mxu0 %v2015_v10 }
  0x1f   :  { %1696 = vmatpush3.msra.mxu1 %v2064_v26  ;;  %1704 = vmatprep.subr.mxu0 %v1943_v13  ;;  %v1213_v53 = vand.u32 4294901760, %v1212_v51 }
  0x20   :  { %1697 = vmatprep.subr.mxu1 %v1943_v13 }
  0x21   :  { %1698 = vmatpush3.msra.mxu1 %v2068_v27 }
  0x22   :  { %1699 = vmatprep.subr.mxu1 %v1943_v13 }
  0x23   :  { %1700 = vmatpush3.msra.mxu1 %v2074_v28 }
  0x24   :  { %1715 = vmatprep.subr.mxu1 %v1943_v13 }
  0x90   :  { %v96_v31 = vpop.permute.xlu0 %95  ;;  %v110_v47 = vpop.permute.xlu1 %109 }
  0x91   :  { %vm97_vm2 = vcmp.eq.s32.totalorder %v96_v31, %v2082_v30  ;;  %vm111_vm4 = vcmp.eq.s32.totalorder %v110_v47, %v2082_v30 }
  0x92   :  { %v1598_v32 = vsel %vm97_vm2, 1.0, %v1943_v13  ;;  %v1600_v50 = vsel %vm111_vm4, 1.0, %v1943_v13 }
  0x93   :  { %v120_v33 = vsel %vm118_vm1, %v1598_v32, 0  ;;  %1702 = vmatmul.mubr.msk.f32.vlgmr.msra.gmra.mxu1 %vm118_vm1, %v1598_v32  ;;  %v1100_v52 = vsel %vm1098_vm5, %v1600_v50, 0 }
  0x94   :  { %v192_v34 = vsub.f32 %v120_v33, %v120_v33  ;;  %1716 = vmatpush3.msra.mxu1 %v2009_v6  ;;  %1723 = vmatprep.mubr.msk.f32.mxu1 %vm1944_vm0, %v1943_v13  ;;  %v103_v38 = vpop.permute.xlu0 %102  ;;  %v1169_v54 = vsub.f32 %v1100_v52, %v1100_v52 }
  0x95   :  { %1717 = vmatprep.subr.mxu1 %v1943_v13  ;;  %vm104_vm3 = vcmp.eq.s32.totalorder %v103_v38, %v2082_v30 }
  0x96   :  { %1718 = vmatpush3.msra.mxu1 %v2011_v8  ;;  %v193_v35 = vand.u32 4294901760, %v192_v34  ;;  %v2119_v39 = vsel %vm104_vm3, 1.0, %v1943_v13  ;;  %v1170_v55 = vand.u32 4294901760, %v1169_v54 }
  0x97   :  { %1719 = vmatprep.subr.mxu1 %v1943_v13  ;;  %v609_v40 = vsel %vm118_vm1, %v2119_v39, 0 }
  0x98   :  { %1720 = vmatpush3.msra.mxu1 %v2013_v9  ;;  %v194_v36 = vsub.f32 %v192_v34, %v193_v35  ;;  %v2134_v41 = vsub.f32 %v609_v40, %v609_v40  ;;  %v1171_v56 = vsub.f32 %v1169_v54, %v1170_v55 }
  0x99   :  { %1721 = vmatprep.subr.mxu1 %v1943_v13 }
  0x9a   :  { %1722 = vmatpush3.msra.mxu1 %v2015_v10  ;;  %v195_v37 = vand.u32 4294901760, %v194_v36  ;;  %v682_v43 = vand.u32 4294901760, %v2134_v41  ;;  %v1172_v57 = vand.u32 4294901760, %v1171_v56 }
  0x9b   :  { %1724 = vmatmul.mubr.f32.vlgmr.msra.gmra.mxu1 %v193_v35  ;;  %1737 = vmatprep.subr.mxu1 %v1943_v13 }
  0x9c   :  { %1738 = vmatpush3.msra.mxu1 %v2009_v6  ;;  %1691 = vmatmul.mubr.f32.vlgmr.msra.gmra.mxu0 %v195_v37  ;;  %v683_v45 = vsub.f32 %v2134_v41, %v682_v43 }
  0x9d   :  { %1705 = vmatpush3.msra.mxu0 %v2018_v11  ;;  %1739 = vmatprep.subr.mxu1 %v1943_v13 }
  0x9e   :  { %1706 = vmatprep.subr.mxu0 %v1943_v13  ;;  %1740 = vmatpush3.msra.mxu1 %v2011_v8  ;;  %v684_v48 = vand.u32 4294901760, %v683_v45 }
  0x9f   :  { %1707 = vmatpush3.msra.mxu0 %v2025_v14  ;;  %1741 = vmatprep.subr.mxu1 %v1943_v13 }
  0xa0   :  { %1708 = vmatprep.subr.mxu0 %v1943_v13  ;;  %1742 = vmatpush3.msra.mxu1 %v2013_v9 }
  0xa1   :  { %1709 = vmatpush3.msra.mxu0 %v2028_v15  ;;  %1743 = vmatprep.subr.mxu1 %v1943_v13 }
  0xa2   :  { %1710 = vmatprep.subr.mxu0 %v1943_v13  ;;  %1744 = vmatpush3.msra.mxu1 %v2015_v10 }
  0xa3   :  { %1745 = vmatprep.mubr.msk.f32.mxu1 %vm1944_vm0, %v1943_v13  ;;  %1711 = vmatpush3.msra.mxu0 %v2031_v16 }
  0xa4   :  { %1712 = vmatprep.mubr.msk.f32.mxu0 %vm1944_vm0, %v1943_v13  ;;  %1746 = vmatmul.mubr.msk.f32.vlgmr.msra.gmra.mxu1 %vm118_vm1, %v1598_v32 }
  0xa5   :  { %1759 = vmatprep.subr.mxu1 %v1943_v13  ;;  %1713 = vmatmul.mubr.f32.vlgmr.msra.gmra.mxu0 %v192_v34 }
  0xa6   :  { %1726 = vmatprep.subr.mxu0 %v1943_v13  ;;  %1760 = vmatpush3.msra.mxu1 %v2059_v24 }
  0xa7   :  { %1727 = vmatpush3.msra.mxu0 %v2036_v17  ;;  %1761 = vmatprep.subr.mxu1 %v1943_v13 }
  0xa8   :  { %1728 = vmatprep.subr.mxu0 %v1943_v13  ;;  %1762 = vmatpush3.msra.mxu1 %v2064_v26 }
  0xa9   :  { %1729 = vmatpush3.msra.mxu0 %v2042_v18  ;;  %1763 = vmatprep.subr.mxu1 %v1943_v13 }
  0xaa   :  { %1730 = vmatprep.subr.mxu0 %v1943_v13  ;;  %1764 = vmatpush3.msra.mxu1 %v2068_v27 }
  0xab   :  { %1731 = vmatpush3.msra.mxu0 %v2045_v19  ;;  %1765 = vmatprep.subr.mxu1 %v1943_v13 }
  0xac   :  { %1732 = vmatprep.subr.mxu0 %v1943_v13  ;;  %1766 = vmatpush3.msra.mxu1 %v2074_v28 }
  0xad   :  { %1767 = vmatprep.mubr.msk.f32.mxu1 %vm1944_vm0, %v1943_v13  ;;  %1733 = vmatpush3.msra.mxu0 %v2048_v20 }
  0xae   :  { %1734 = vmatprep.mubr.msk.f32.mxu0 %vm1944_vm0, %v1943_v13  ;;  %1768 = vmatmul.mubr.msk.f32.vlgmr.msra.gmra.mxu1 %vm118_vm1, %v2119_v39 }
  0xaf   :  { %1781 = vmatprep.subr.mxu1 %v1943_v13  ;;  %1735 = vmatmul.mubr.msk.f32.vlgmr.msra.gmra.mxu0 %vm118_vm1, %v1598_v32 }
  0xb0   :  { %1748 = vmatprep.subr.mxu0 %v1943_v13  ;;  %1782 = vmatpush3.msra.mxu1 %v2009_v6 }
  0xb1   :  { %1749 = vmatpush3.msra.mxu0 %v2009_v6  ;;  %1783 = vmatprep.subr.mxu1 %v1943_v13 }
  0xb2   :  { %1750 = vmatprep.subr.mxu0 %v1943_v13  ;;  %1784 = vmatpush3.msra.mxu1 %v2011_v8 }
  0xb3   :  { %1751 = vmatpush3.msra.mxu0 %v2011_v8  ;;  %1785 = vmatprep.subr.mxu1 %v1943_v13 }
  0xb4   :  { %1752 = vmatprep.subr.mxu0 %v1943_v13  ;;  %1786 = vmatpush3.msra.mxu1 %v2013_v9 }
  0xb5   :  { %1753 = vmatpush3.msra.mxu0 %v2013_v9  ;;  %1787 = vmatprep.subr.mxu1 %v1943_v13 }
  0xb6   :  { %1754 = vmatprep.subr.mxu0 %v1943_v13  ;;  %1788 = vmatpush3.msra.mxu1 %v2015_v10 }
  0xb7   :  { %1789 = vmatprep.mubr.msk.f32.mxu1 %vm1944_vm0, %v1943_v13  ;;  %1755 = vmatpush3.msra.mxu0 %v2015_v10 }
  0xb8   :  { %1756 = vmatprep.mubr.msk.f32.mxu0 %vm1944_vm0, %v1943_v13  ;;  %1790 = vmatmul.mubr.f32.vlgmr.msra.gmra.mxu1 %v682_v43 }
  0xb9   :  { %1803 = vmatprep.subr.mxu1 %v1943_v13  ;;  %1757 = vmatmul.mubr.f32.vlgmr.msra.gmra.mxu0 %v684_v48 }
  0xba   :  { %1770 = vmatprep.subr.mxu0 %v1943_v13  ;;  %1804 = vmatpush3.msra.mxu1 %v2009_v6 }
  0xbb   :  { %1771 = vmatpush3.msra.mxu0 %v2018_v11  ;;  %1805 = vmatprep.subr.mxu1 %v1943_v13 }
  0xbc   :  { %1772 = vmatprep.subr.mxu0 %v1943_v13  ;;  %1806 = vmatpush3.msra.mxu1 %v2011_v8 }
  0xbd   :  { %1773 = vmatpush3.msra.mxu0 %v2025_v14  ;;  %1807 = vmatprep.subr.mxu1 %v1943_v13 }
  0xbe   :  { %1774 = vmatprep.subr.mxu0 %v1943_v13  ;;  %1808 = vmatpush3.msra.mxu1 %v2013_v9 }
  0xbf   :  { %1775 = vmatpush3.msra.mxu0 %v2028_v15  ;;  %1809 = vmatprep.subr.mxu1 %v1943_v13 }
  0xc0   :  { %1776 = vmatprep.subr.mxu0 %v1943_v13  ;;  %1810 = vmatpush3.msra.mxu1 %v2015_v10 }
  0xc1   :  { %1811 = vmatprep.mubr.msk.f32.mxu1 %vm1944_vm0, %v1943_v13  ;;  %1777 = vmatpush3.msra.mxu0 %v2031_v16 }
  0xc2   :  { %1778 = vmatprep.mubr.msk.f32.mxu0 %vm1944_vm0, %v1943_v13  ;;  %1812 = vmatmul.mubr.msk.f32.vlgmr.msra.gmra.mxu1 %vm118_vm1, %v2119_v39 }
  0xc3   :  { %1779 = vmatmul.mubr.f32.vlgmr.msra.gmra.mxu0 %v2134_v41  ;;  %1792 = vmatprep.subr.mxu0 %v1943_v13 }
  0xc4   :  { %1793 = vmatpush3.msra.mxu0 %v2036_v17  ;;  %1819 = vmatprep.subr.mxu1 %v1943_v13 }
  0xc5   :  { %1794 = vmatprep.subr.mxu0 %v1943_v13  ;;  %1820 = vmatpush3.msra.mxu1 %v1213_v53 }
  0xc6   :  { %1821 = vmatprep.mubr.msk.f32.mxu1 %vm1944_vm0, %v1943_v13  ;;  %1795 = vmatpush3.msra.mxu0 %v2042_v18 }
  0xc7   :  { %1822 = vmatmul.mubr.msk.f32.vlgmr.msra.gmra.mxu1 %vm1098_vm5, %v1600_v50  ;;  %1796 = vmatprep.subr.mxu0 %v1943_v13 }
  0xc8   :  { %1797 = vmatpush3.msra.mxu0 %v2045_v19  ;;  %1829 = vmatprep.subr.mxu1 %v1943_v13 }
  0xc9   :  { %1798 = vmatprep.subr.mxu0 %v1943_v13  ;;  %1830 = vmatpush3.msra.mxu1 %v2154_v44 }
  0xca   :  { %1831 = vmatprep.mubr.msk.f32.mxu1 %vm1944_vm0, %v1943_v13  ;;  %1799 = vmatpush3.msra.mxu0 %v2048_v20 }
  0xcb   :  { %1800 = vmatprep.mubr.msk.f32.mxu0 %vm1944_vm0, %v1943_v13  ;;  %1832 = vmatmul.mubr.f32.vlgmr.msra.gmra.mxu1 %v1170_v55 }
  0xcc   :  { %1801 = vmatmul.mubr.msk.f32.vlgmr.msra.gmra.mxu0 %vm118_vm1, %v2119_v39  ;;  %1814 = vmatprep.subr.mxu0 %v1943_v13 }
  0xcd   :  { %1815 = vmatpush3.msra.mxu0 %v2154_v44  ;;  %1839 = vmatprep.subr.mxu1 %v1943_v13 }
  0xce   :  { %1840 = vmatpush3.msra.mxu1 %v2154_v44  ;;  %1841 = vmatprep.mubr.msk.f32.mxu1 %vm1944_vm0, %v1943_v13 }
  0xcf   :  { %1816 = vmatprep.mubr.msk.f32.mxu0 %vm1944_vm0, %v1943_v13  ;;  %1842 = vmatmul.mubr.msk.f32.vlgmr.msra.gmra.mxu1 %vm1098_vm5, %v1600_v50 }
  0xd0   :  { %1817 = vmatmul.mubr.f32.vlgmr.msra.gmra.mxu0 %v1172_v57  ;;  %1824 = vmatprep.subr.mxu0 %v1943_v13 }
  0xd1   :  { %1825 = vmatpush3.msra.mxu0 %v2166_v46  ;;  %1826 = vmatprep.mubr.msk.f32.mxu0 %vm1944_vm0, %v1943_v13 }
  0xd2   :  { %1834 = vmatprep.subr.mxu0 %v1943_v13 }
  0xd4   :  { %1827 = vmatmul.mubr.f32.vlgmr.msra.gmra.mxu0 %v1169_v54 }
  0xd5   :  { %1835 = vmatpush3.msra.mxu0 %v1211_v49  ;;  %1836 = vmatprep.mubr.msk.f32.mxu0 %vm1944_vm0, %v1943_v13 }
  0xd8   :  { %1837 = vmatmul.mubr.msk.f32.vlgmr.msra.gmra.mxu0 %vm1098_vm5, %v1600_v50 }
 0x153   :  { %v288_v58 = vpop.f32.mrf.mxu1 }
 0x155   :  { %v1703_v59 = vpop.f32.mrf.mxu1 }
 0x15b   :  { %v445_v60 = vpop.f32.mrf.mxu1 }
 0x15c   :  { %v197_v61 = vpop.f32.mrf.mxu0 }
 0x15d   :  { %v1725_v62 = vpop.f32.mrf.mxu1  ;;  %v289_v4 = vadd.f32 %v288_v58, %v197_v61 }
 0x15e   :  { %v1692_v63 = vpop.f32.mrf.mxu0 }
 0x164   :  { %v603_v0 = vpop.f32.mrf.mxu1 }
 0x165   :  { %v368_v1 = vpop.f32.mrf.mxu0 }
 0x166   :  { %v1747_v2 = vpop.f32.mrf.mxu1  ;;  %v369_v5 = vadd.f32 %v368_v1, %v289_v4 }
 0x167   :  { %v1714_v3 = vpop.f32.mrf.mxu0 }
 0x168   :  { %v446_v7 = vadd.f32 %v445_v60, %v369_v5 }
 0x16e   :  { %v777_v6 = vpop.f32.mrf.mxu1 }
 0x16f   :  { %v528_v8 = vpop.f32.mrf.mxu0 }
 0x170   :  { %v529_v9 = vadd.f32 %v528_v8, %v446_v7  ;;  %v1769_v10 = vpop.f32.mrf.mxu1 }
 0x171   :  { %v1736_v11 = vpop.f32.mrf.mxu0 }
 0x172   :  { %v604_v12 = vadd.f32 %v603_v0, %v529_v9 }
 0x174   :  { %607 = vst [vmem:[#allocation4] sm:$0xff] %v604_v12 }
 0x175   :  { %1884 = shalt.err (!%p1881_p9)
}
 0x176   :  { %1558 = dma.vmem_to_hbm [thread:$0]  %s1556_s2, 128, %s2254_s5, [#allocation5]  }
 0x177   :  { %s1946_s5 = smov [#allocation6]   ;;  %s1947_s21 = smov [#allocation8]  }
 0x178   :  { %v934_v13 = vpop.f32.mrf.mxu1  ;;  %s1565_s20 = sshll.u32 %s1946_s5, 4  ;;  %s1575_s22 = sshll.u32 %s1947_s21, 4  ;;  %s1566_s20 = int_to_ptr.vmem [resolvable:$true] %s1565_s20  ;;  %s1576_s22 = int_to_ptr.vmem [resolvable:$true] %s1575_s22 }
 0x179   :  { %v686_v14 = vpop.f32.mrf.mxu0  ;;  %s1893_s23 = scalar_lea.vmem %s1566_s20, 128  ;;  %p1898_p11 = scmp.lt.s32.totalorder %s1566_s20, %s1566_s20 }
 0x17a   :  { %v1791_v15 = vpop.f32.mrf.mxu1  ;;  %v778_v20 = vadd.f32 %v777_v6, %v686_v14  ;;  %p1894_p10 = scmp.ne.s32.totalorder %s1566_s20, %s1893_s23  ;;  %p1899_p12 = scmp.lt.s32.totalorder %s1893_s23, %s1893_s23 }
 0x17b   :  { %v1758_v16 = vpop.f32.mrf.mxu0 }
 0x17c   :  { %p1900_p13 = por %p1899_p12, %p1898_p11 }
 0x17e   :  { %p1901_p0 = pnand %p1900_p13, %p1894_p10 }
 0x182   :  { %v1092_v17 = vpop.f32.mrf.mxu1 }
 0x183   :  { %v857_v18 = vpop.f32.mrf.mxu0 }
 0x184   :  { %v1813_v19 = vpop.f32.mrf.mxu1  ;;  %v858_v22 = vadd.f32 %v857_v18, %v778_v20 }
 0x185   :  { %v1780_v21 = vpop.f32.mrf.mxu0 }
 0x186   :  { %v935_v26 = vadd.f32 %v934_v13, %v858_v22 }
 0x187   :  { %v1250_v23 = vpop.f32.mrf.mxu1 }
 0x189   :  { %v1823_v24 = vpop.f32.mrf.mxu1 }
 0x18b   :  { %v1398_v25 = vpop.f32.mrf.mxu1 }
 0x18c   :  { %v1017_v27 = vpop.f32.mrf.mxu0 }
 0x18d   :  { %v1018_v28 = vadd.f32 %v1017_v27, %v935_v26  ;;  %v1833_v29 = vpop.f32.mrf.mxu1 }
 0x18e   :  { %v1802_v30 = vpop.f32.mrf.mxu0 }
 0x18f   :  { %v1544_v31 = vpop.f32.mrf.mxu1  ;;  %v1093_v32 = vadd.f32 %v1092_v17, %v1018_v28 }
 0x190   :  { %v1174_v33 = vpop.f32.mrf.mxu0 }
 0x191   :  { %v1843_v34 = vpop.f32.mrf.mxu1  ;;  %1096 = vst [vmem:[#allocation8] sm:$0xff] %v1093_v32  ;;  %v1251_v36 = vadd.f32 %v1250_v23, %v1174_v33 }
 0x192   :  { %v1818_v35 = vpop.f32.mrf.mxu0 }
 0x194   :  { %v1324_v37 = vpop.f32.mrf.mxu0 }
 0x195   :  { %v1325_v38 = vadd.f32 %v1324_v37, %v1251_v36 }
 0x196   :  { %v1828_v39 = vpop.f32.mrf.mxu0 }
 0x197   :  { %v1399_v40 = vadd.f32 %v1398_v25, %v1325_v38 }
 0x198   :  { %v1472_v41 = vpop.f32.mrf.mxu0 }
 0x199   :  { %v1473_v42 = vadd.f32 %v1472_v41, %v1399_v40 }
 0x19a   :  { %v1838_v43 = vpop.f32.mrf.mxu0 }
 0x19b   :  { %v1545_v44 = vadd.f32 %v1544_v31, %v1473_v42 }
 0x19d   :  { %1548 = vst [vmem:[#allocation6] sm:$0xff] %v1545_v44 }
 0x19e   :  { %1904 = shalt.err (!%p1901_p0)
}
 0x19f   :  { %1568 = dma.vmem_to_hbm [thread:$0]  %s1566_s20, 128, %s2255_s6, [#allocation7]  }
 0x1a0   :  { %s1913_s26 = scalar_lea.vmem %s1576_s22, 128  ;;  %p1918_p2 = scmp.lt.s32.totalorder %s1576_s22, %s1576_s22 }
 0x1a1   :  { %p1914_p1 = scmp.ne.s32.totalorder %s1576_s22, %s1913_s26  ;;  %p1919_p3 = scmp.lt.s32.totalorder %s1913_s26, %s1913_s26 }
 0x1a3   :  { %p1920_p4 = por %p1919_p3, %p1918_p2 }
 0x1a5   :  { %p1921_p5 = pnand %p1920_p4, %p1914_p1 }
 0x1a7   :  { %1924 = shalt.err (!%p1921_p5)
}
 0x1a8   :  { %1578 = dma.vmem_to_hbm [thread:$0]  %s1576_s22, 128, %s2256_s7, [#allocation7]  }
 0x1a9   :  { %1937 = dma.done.wait [#allocation5], 128  }
 0x1aa   :  { %1938 = vsyncadd [#allocation5], 4294967168 }
 0x1ab   :  { %1939 = dma.done.wait [#allocation7], 256  }
 0x1ac   :  { %1940 = vsyncadd [#allocation7], 4294967040 }
 0x1ad   :  { %1588 = vsyncpa [#allocation5], 1 }
 0x1ae   :  { %1589 = vsyncpa [#allocation7], 1 }

</bundles_post_ra>
